<compile_context>
chip_gen: v6e
topology: v6e:2x2x1
jax: 0.10.0
libtpu: 0.0.40
codegen_flags: <defaults>
</compile_context>

<pallas_src>
import functools
import math

import numpy as np

import jax
import jax.numpy as jnp
from jax.experimental import pallas as pl
from jax.experimental.pallas import tpu as pltpu


def _round_up(x: int, m: int) -> int:
    return ((x + m - 1) // m) * m


_VMEM_BUDGET = 40 << 20  # conservative per-call plan budget; safe on v5e/v6e/v7x


def _vmem_footprint(tm, dp, th, x_bytes, c_bytes, wbuf):
    """Rough VMEM bytes for one grid step (buffers + scratch + f32 temporaries)."""
    return int(
        2 * tm * dp * x_bytes            # x tile, double-buffered
        + 2 * tm * dp * x_bytes          # out tile, double-buffered
        + wbuf * dp * th * c_bytes       # W1 tile(s)
        + wbuf * th * dp * c_bytes       # W2 tile(s)
        + wbuf * th * 4 + dp * 4         # biases
        + tm * dp * 4                    # f32 accumulator scratch
        + tm * th * 4 + tm * dp * 4      # in-kernel f32 temporaries
    )


def _default_block_m() -> int:
    try:
        kind = jax.devices()[0].device_kind.lower()
    except Exception:  # pragma: no cover - defensive
        return 256
    if "v5e" in kind or "v5 lite" in kind or "v5lite" in kind:
        return 128   # v5e: 4x128x128 MXU, 16 MiB default scoped VMEM
    if "v6" in kind:
        return 512   # v6e: 2x256x256 MXU, plenty of VMEM headroom
    return 256       # v7x / others: 256-wide MXU, 64 MiB per-TC VMEM


def _residual_mlp_kernel(x_ref, w1_ref, b1_ref, w2_ref, b2_ref, o_ref, acc_ref,
                         *, apply_relu: bool, compute_dtype):
    """One (tm, Dp) output tile; grid axis 1 walks hidden-dim (H) tiles.

    ReLU is elementwise per hidden unit, so fn decomposes exactly over H tiles:
        fn(x) = sum_k relu(x @ W1[:, k] + b1[k]) @ W2[k, :]  + b2
    """
    hk = pl.program_id(1)

    @pl.when(hk == 0)
    def _init():
        acc_ref[...] = jnp.zeros_like(acc_ref)

    x = x_ref[...]                                              # (tm, Dp), native dtype
    h = jnp.dot(x.astype(compute_dtype), w1_ref[...],
                preferred_element_type=jnp.float32)             # MXU, f32 acc
    h = h + b1_ref[...]                                         # f32 epilogue (VPU)
    if apply_relu:
        h = jnp.maximum(h, 0.0)
    acc_ref[...] += jnp.dot(h.astype(compute_dtype), w2_ref[...],
                            preferred_element_type=jnp.float32)

    @pl.when(hk == pl.num_programs(1) - 1)
    def _finalize():
        y = acc_ref[...] + b2_ref[...] + x.astype(jnp.float32)  # residual add in f32
        o_ref[...] = y.astype(o_ref.dtype)                      # lane-dense store


def residual_mlp(x, w1_t, b1, w2_t, b2, *, apply_relu=True,
                 compute_dtype=jnp.bfloat16, block_m=None, block_h=None):
    """y = fn(x) + x with fn = (relu?)(x @ w1_t + b1) @ w2_t + b2.

    w1_t: [D, H], w2_t: [H, D] (PyTorch weights already transposed), biases 1-D.
    Feature dims are zero-padded to lane multiples only when needed; padding is a
    no-op for lane-aligned shapes (pre-pad/pre-cast weights once at init to avoid
    any per-call HBM traffic).
    """
    m, d = x.shape
    d1, h = w1_t.shape
    h2, d2 = w2_t.shape
    assert d == d1 and h == h2 and d2 == d, "Residual requires fn output dim == input dim"
    assert b1.shape == (h,) and b2.shape == (d,)

    x_bytes = jnp.dtype(x.dtype).itemsize
    c_bytes = jnp.dtype(compute_dtype).itemsize

    d_p = _round_up(d, 128)
    h_p = _round_up(h, 128)

    if block_m is None:
        block_m = _default_block_m()
    tm = min(block_m, _round_up(m, 8))
    if m > 256:
        # >= 2 M-steps: feeds both TensorCores on v7x (parallel axis) and gives the
        # software pipeline something to overlap.
        tm = min(tm, _round_up((m + 1) // 2, 8))

    # Hidden-dim tile: keep W1/W2 fully resident (fetched once, single-buffered)
    # when they fit the budget; otherwise tile H with an f32 accumulator so VMEM
    # stays bounded for wide MLPs.
    th = h_p if block_h is None else min(_round_up(block_h, 128), h_p)

    def _fits(tm_, th_):
        wbuf = 1 if th_ >= h_p else 2
        return _vmem_footprint(tm_, d_p, th_, x_bytes, c_bytes, wbuf) <= _VMEM_BUDGET

    while not _fits(tm, th) and th > 128:
        th = max(128, _round_up(th // 2, 128))
    while not _fits(tm, th) and tm > 8:
        tm = max(8, _round_up(tm // 2, 8))

    m_p = _round_up(m, tm)
    h_pp = _round_up(h_p, th)
    n_h = h_pp // th
    single_h = n_h == 1

    # Pad only when needed (lane-aligned shapes skip these ops entirely).
    x_p = x if (m_p == m and d_p == d) else jnp.pad(x, ((0, m_p - m), (0, d_p - d)))
    w1_p = w1_t if (d_p == d and h_pp == h) else jnp.pad(w1_t, ((0, d_p - d), (0, h_pp - h)))
    w2_p = w2_t if (h_pp == h and d_p == d) else jnp.pad(w2_t, ((0, h_pp - h), (0, d_p - d)))
    b1_p = b1 if h_pp == h else jnp.pad(b1, (0, h_pp - h))
    b2_p = b2 if d_p == d else jnp.pad(b2, (0, d_p - d))
    if w1_p.dtype != compute_dtype:
        w1_p = w1_p.astype(compute_dtype)
    if w2_p.dtype != compute_dtype:
        w2_p = w2_p.astype(compute_dtype)
    b1_p = b1_p.reshape(1, h_pp).astype(jnp.float32)
    b2_p = b2_p.reshape(1, d_p).astype(jnp.float32)

    grid = (m_p // tm, n_h)
    kernel = functools.partial(_residual_mlp_kernel,
                               apply_relu=apply_relu, compute_dtype=compute_dtype)

    m_steps = m_p // tm
    w_bytes = 2 * d_p * h_pp * c_bytes * (1 if single_h else m_steps)
    cost = pl.CostEstimate(
        flops=int(4 * m_p * d_p * h_pp + 3 * m_p * (d_p + h_pp)),
        transcendentals=0,
        bytes_accessed=int(2 * m_p * d_p * x_bytes + w_bytes + 4 * (h_pp + d_p)),
    )

    def _build_and_call(use_buffered):
        def _spec(shape, imap, nbuf=None):
            if use_buffered and nbuf is not None:
                return pl.BlockSpec(shape, imap, pipeline_mode=pl.Buffered(nbuf))
            return pl.BlockSpec(shape, imap)

        # Resident weights (constant index_map) -> single buffer; H-tiled weights
        # keep default double-buffering so the weight DMA pipelines against MXU.
        w_nbuf = 1 if single_h else None

        in_specs = [
            pl.BlockSpec((tm, d_p), lambda i, k: (i, 0)),        # x tile (revisited over k)
            _spec((d_p, th), lambda i, k: (0, k), w_nbuf),       # W1
            _spec((1, th), lambda i, k: (0, k), w_nbuf),         # b1
            _spec((th, d_p), lambda i, k: (k, 0), w_nbuf),       # W2
            _spec((1, d_p), lambda i, k: (0, 0), 1),             # b2 (constant index)
        ]
        out_specs = pl.BlockSpec((tm, d_p), lambda i, k: (i, 0))  # lane-dense, resident over k

        wbuf = 1 if (use_buffered and single_h) else 2
        footprint = _vmem_footprint(tm, d_p, th, x_bytes, c_bytes, wbuf)
        vmem_limit = int(min(max(footprint * 1.5, 32 << 20), 60 << 20))

        return pl.pallas_call(
            kernel,
            out_shape=jax.ShapeDtypeStruct((m_p, d_p), x.dtype),
            grid_spec=pltpu.PrefetchScalarGridSpec(
                num_scalar_prefetch=0,
                grid=grid,
                in_specs=in_specs,
                out_specs=out_specs,
                scratch_shapes=[pltpu.VMEM((tm, d_p), jnp.float32)],
            ),
            compiler_params=pltpu.CompilerParams(
                dimension_semantics=("parallel", "arbitrary"),
                vmem_limit_bytes=vmem_limit,
            ),
            cost_estimate=cost,
        )(x_p, w1_p, b1_p, w2_p, b2_p)

    try:
        out_p = _build_and_call(True)
    except Exception:
        # Fallback if single-buffered pipeline_mode is unsupported on this JAX
        # version: identical kernel with default double-buffering.
        out_p = _build_and_call(False)

    if m_p == m and d_p == d:
        return out_p
    return out_p[:m, :d]


def init_mlp_params(key, d, h):
    """Deterministic nn.Linear-style init: U(-1/sqrt(fan_in), 1/sqrt(fan_in)).
    Weights stored already transposed: W1^T [d, h], W2^T [h, d]."""
    k1w, k1b, k2w, k2b = jax.random.split(key, 4)
    bd = 1.0 / math.sqrt(d)
    bh = 1.0 / math.sqrt(h)
    w1_t = jax.random.uniform(k1w, (d, h), jnp.float32, -bd, bd)
    b1 = jax.random.uniform(k1b, (h,), jnp.float32, -bd, bd)
    w2_t = jax.random.uniform(k2w, (h, d), jnp.float32, -bh, bh)
    b2 = jax.random.uniform(k2b, (d,), jnp.float32, -bh, bh)
    return w1_t, b1, w2_t, b2


def _reference(x, w1_t, b1, w2_t, b2, apply_relu=True):
    """Pure numpy f32 reference for Residual(MLP)."""
    xf = np.asarray(x, np.float32)
    h = xf @ np.asarray(w1_t, np.float32) + np.asarray(b1, np.float32)
    if apply_relu:
        h = np.maximum(h, 0.0)
    return h @ np.asarray(w2_t, np.float32) + np.asarray(b2, np.float32) + xf


if __name__ == "__main__":
    key = jax.random.PRNGKey(0)

    # --- test 1: lane-aligned shapes, f32 MXU operands ----------------------
    batch, D, H = 16, 128, 256
    key, kx, kp = jax.random.split(key, 3)
    x = jax.random.normal(kx, (batch, D), jnp.float32)
    w1_t, b1, w2_t, b2 = init_mlp_params(kp, D, H)
    ref = _reference(x, w1_t, b1, w2_t, b2)

    out = jax.block_until_ready(
        residual_mlp(x, w1_t, b1, w2_t, b2, compute_dtype=jnp.float32))
    assert out.shape == (batch, D)
    assert np.allclose(np.asarray(out), ref, atol=1e-4, rtol=1e-4), "f32 resident path mismatch"

    # --- test 2: odd shapes exercise the pad-to-(8,128) path ----------------
    batch2, D2, H2 = 5, 48, 72
    key, kx2, kp2 = jax.random.split(key, 3)
    x2 = jax.random.normal(kx2, (batch2, D2), jnp.float32)
    p2 = init_mlp_params(kp2, D2, H2)
    out2 = jax.block_until_ready(residual_mlp(x2, *p2, compute_dtype=jnp.float32))
    ref2 = _reference(x2, *p2)
    assert out2.shape == (batch2, D2)
    assert np.allclose(np.asarray(out2), ref2, atol=1e-4, rtol=1e-4), "padded-path mismatch"

    # --- test 3: H-tiled accumulator path (2 hidden-dim grid steps) ---------
    out_ht = jax.block_until_ready(
        residual_mlp(x, w1_t, b1, w2_t, b2, compute_dtype=jnp.float32, block_h=128))
    assert np.allclose(np.asarray(out_ht), ref, atol=1e-4, rtol=1e-4), "H-tiled path mismatch"

    # --- test 4: default bf16 MXU operands (v6e/v7x fast path), f32 epilogue -
    out_bf = jax.block_until_ready(residual_mlp(x, w1_t, b1, w2_t, b2))
    assert np.allclose(np.asarray(out_bf), ref, atol=1.5e-1, rtol=5e-2), "bf16 path mismatch"

    # --- test 5: bf16 activations end-to-end (halved x/out DMA bytes) -------
    xb = x.astype(jnp.bfloat16)
    out_b = jax.block_until_ready(
        residual_mlp(xb, w1_t.astype(jnp.bfloat16), b1, w2_t.astype(jnp.bfloat16), b2))
    assert out_b.dtype == jnp.bfloat16
    assert np.allclose(np.asarray(out_b, np.float32), ref, atol=2.5e-1, rtol=1e-1), \
        "bf16-activation path mismatch"

    print("KERNEL_OK")
</pallas_src>

<mosaic_0001>
module attributes {stable_mosaic.version = 11 : i64} {
  func.func @_residual_mlp_kernel(%arg0: i32, %arg1: i32, %arg2: memref<16x128xf32, #tpu.memory_space<vmem>>, %arg3: memref<128x256xf32, #tpu.memory_space<vmem>>, %arg4: memref<1x256xf32, #tpu.memory_space<vmem>>, %arg5: memref<256x128xf32, #tpu.memory_space<vmem>>, %arg6: memref<1x128xf32, #tpu.memory_space<vmem>>, %arg7: memref<16x128xf32, #tpu.memory_space<vmem>>, %arg8: memref<16x128xf32, #tpu.memory_space<vmem>>) attributes {dimension_semantics = [#tpu.dimension_semantics<parallel>, #tpu.dimension_semantics<arbitrary>], iteration_bounds = array<i64: 1, 1>, scalar_prefetch = 0 : i64, scratch_operands = 1 : i64, tpu.core_type = #tpu.core_type<tc>, window_params = [{transform_indices = @transform_0, window_bounds = array<i64: 16, 128>}, {pipeline_mode = #tpu.pipeline_mode<synchronous>, transform_indices = @transform_1, window_bounds = array<i64: 128, 256>}, {pipeline_mode = #tpu.pipeline_mode<synchronous>, transform_indices = @transform_2, window_bounds = array<i64: 1, 256>}, {pipeline_mode = #tpu.pipeline_mode<synchronous>, transform_indices = @transform_3, window_bounds = array<i64: 256, 128>}, {pipeline_mode = #tpu.pipeline_mode<synchronous>, transform_indices = @transform_4, window_bounds = array<i64: 1, 128>}, {transform_indices = @transform_5, window_bounds = array<i64: 16, 128>}]} {
    %c0_i32 = arith.constant 0 : i32
    %0 = arith.cmpi eq, %arg1, %c0_i32 : i32
    %1 = arith.extui %0 : i1 to i32
    %c0_i32_0 = arith.constant 0 : i32
    %2 = arith.cmpi ne, %1, %c0_i32_0 : i32
    scf.if %2 {
      %cst_16 = arith.constant 0.000000e+00 : f32
      %19 = vector.broadcast %cst_16 : f32 to vector<16x128xf32>
      %c0_17 = arith.constant 0 : index
      %c0_18 = arith.constant 0 : index
      %20 = vector.load %arg8[%c0_17, %c0_18] : memref<16x128xf32, #tpu.memory_space<vmem>>, vector<16x128xf32>
      tpu.vector_store %arg8[%c0_17, %c0_18], %19 {strides = array<i32>} : memref<16x128xf32, #tpu.memory_space<vmem>>, vector<16x128xf32>,
    } else {
    }
    %c0 = arith.constant 0 : index
    %c0_1 = arith.constant 0 : index
    %3 = vector.load %arg2[%c0, %c0_1] : memref<16x128xf32, #tpu.memory_space<vmem>>, vector<16x128xf32>
    %c0_2 = arith.constant 0 : index
    %c0_3 = arith.constant 0 : index
    %4 = vector.load %arg3[%c0_2, %c0_3] : memref<128x256xf32, #tpu.memory_space<vmem>>, vector<128x256xf32>
    %cst = arith.constant dense<0.000000e+00> : vector<16x256xf32>
    %5 = tpu.matmul %3, %4, %cst {dimension_numbers = #tpu.dot_dimension_numbers<[1], [0], [0], [1], [0, 0, 1, 1], [], []>} : vector<16x128xf32>, vector<128x256xf32>, vector<16x256xf32> -> vector<16x256xf32>
    %c0_4 = arith.constant 0 : index
    %c0_5 = arith.constant 0 : index
    %6 = vector.load %arg4[%c0_4, %c0_5] : memref<1x256xf32, #tpu.memory_space<vmem>>, vector<1x256xf32>
    %7 = vector.broadcast %6 : vector<1x256xf32> to vector<16x256xf32>
    %8 = arith.addf %5, %7 : vector<16x256xf32>
    %cst_6 = arith.constant 0.000000e+00 : f32
    %9 = vector.broadcast %cst_6 : f32 to vector<16x256xf32>
    %10 = arith.maximumf %8, %9 : vector<16x256xf32>
    %c0_7 = arith.constant 0 : index
    %c0_8 = arith.constant 0 : index
    %11 = vector.load %arg8[%c0_7, %c0_8] : memref<16x128xf32, #tpu.memory_space<vmem>>, vector<16x128xf32>
    %c0_9 = arith.constant 0 : index
    %c0_10 = arith.constant 0 : index
    %12 = vector.load %arg5[%c0_9, %c0_10] : memref<256x128xf32, #tpu.memory_space<vmem>>, vector<256x128xf32>
    %cst_11 = arith.constant dense<0.000000e+00> : vector<16x128xf32>
    %13 = tpu.matmul %10, %12, %cst_11 {dimension_numbers = #tpu.dot_dimension_numbers<[1], [0], [0], [1], [0, 0, 1, 1], [], []>} : vector<16x256xf32>, vector<256x128xf32>, vector<16x128xf32> -> vector<16x128xf32>
    %14 = arith.addf %11, %13 : vector<16x128xf32>
    %c0_12 = arith.constant 0 : index
    %c0_13 = arith.constant 0 : index
    %15 = vector.load %arg8[%c0_12, %c0_13] : memref<16x128xf32, #tpu.memory_space<vmem>>, vector<16x128xf32>
    tpu.vector_store %arg8[%c0_12, %c0_13], %14 {strides = array<i32>} : memref<16x128xf32, #tpu.memory_space<vmem>>, vector<16x128xf32>,
    %c0_i32_14 = arith.constant 0 : i32
    %16 = arith.cmpi eq, %arg1, %c0_i32_14 : i32
    %17 = arith.extui %16 : i1 to i32
    %c0_i32_15 = arith.constant 0 : i32
    %18 = arith.cmpi ne, %17, %c0_i32_15 : i32
    scf.if %18 {
      %c0_16 = arith.constant 0 : index
      %c0_17 = arith.constant 0 : index
      %19 = vector.load %arg8[%c0_16, %c0_17] : memref<16x128xf32, #tpu.memory_space<vmem>>, vector<16x128xf32>
      %c0_18 = arith.constant 0 : index
      %c0_19 = arith.constant 0 : index
      %20 = vector.load %arg6[%c0_18, %c0_19] : memref<1x128xf32, #tpu.memory_space<vmem>>, vector<1x128xf32>
      %21 = vector.broadcast %20 : vector<1x128xf32> to vector<16x128xf32>
      %22 = arith.addf %19, %21 : vector<16x128xf32>
      %23 = arith.addf %22, %3 : vector<16x128xf32>
      %c0_20 = arith.constant 0 : index
      %c0_21 = arith.constant 0 : index
      %24 = vector.load %arg7[%c0_20, %c0_21] : memref<16x128xf32, #tpu.memory_space<vmem>>, vector<16x128xf32>
      tpu.vector_store %arg7[%c0_20, %c0_21], %23 {strides = array<i32>} : memref<16x128xf32, #tpu.memory_space<vmem>>, vector<16x128xf32>,
    } else {
    }
    return
  }
  func.func @transform_0(%arg0: i32, %arg1: i32) -> (i32, i32) {
    %c0_i32 = arith.constant 0 : i32
    %c0_i32_0 = arith.constant 0 : i32
    return %arg0, %c0_i32 : i32, i32
  }
  func.func @transform_1(%arg0: i32, %arg1: i32) -> (i32, i32) {
    %c0_i32 = arith.constant 0 : i32
    %c0_i32_0 = arith.constant 0 : i32
    return %c0_i32, %arg1 : i32, i32
  }
  func.func @transform_2(%arg0: i32, %arg1: i32) -> (i32, i32) {
    %c0_i32 = arith.constant 0 : i32
    %c0_i32_0 = arith.constant 0 : i32
    return %c0_i32, %arg1 : i32, i32
  }
  func.func @transform_3(%arg0: i32, %arg1: i32) -> (i32, i32) {
    %c0_i32 = arith.constant 0 : i32
    %c0_i32_0 = arith.constant 0 : i32
    return %arg1, %c0_i32 : i32, i32
  }
  func.func @transform_4(%arg0: i32, %arg1: i32) -> (i32, i32) {
    %c0_i32 = arith.constant 0 : i32
    %c0_i32_0 = arith.constant 0 : i32
    %c0_i32_1 = arith.constant 0 : i32
    return %c0_i32, %c0_i32_0 : i32, i32
  }
  func.func @transform_5(%arg0: i32, %arg1: i32) -> (i32, i32) {
    %c0_i32 = arith.constant 0 : i32
    %c0_i32_0 = arith.constant 0 : i32
    return %arg0, %c0_i32 : i32, i32
  }
}

module attributes {stable_mosaic.version = 11 : i64} {
  func.func @_residual_mlp_kernel(%arg0: i32, %arg1: i32, %arg2: memref<16x128xf32, #tpu.memory_space<vmem>>, %arg3: memref<128x256xf32, #tpu.memory_space<vmem>>, %arg4: memref<1x256xf32, #tpu.memory_space<vmem>>, %arg5: memref<256x128xf32, #tpu.memory_space<vmem>>, %arg6: memref<1x128xf32, #tpu.memory_space<vmem>>, %arg7: memref<16x128xf32, #tpu.memory_space<vmem>>, %arg8: memref<16x128xf32, #tpu.memory_space<vmem>>) attributes {dimension_semantics = [#tpu.dimension_semantics<parallel>, #tpu.dimension_semantics<arbitrary>], iteration_bounds = array<i64: 1, 1>, scalar_prefetch = 0 : i64, scratch_operands = 1 : i64, tpu.core_type = #tpu.core_type<tc>, window_params = [{transform_indices = @transform_0, window_bounds = array<i64: 16, 128>}, {transform_indices = @transform_1, window_bounds = array<i64: 128, 256>}, {transform_indices = @transform_2, window_bounds = array<i64: 1, 256>}, {transform_indices = @transform_3, window_bounds = array<i64: 256, 128>}, {pipeline_mode = #tpu.pipeline_mode<synchronous>, transform_indices = @transform_4, window_bounds = array<i64: 1, 128>}, {transform_indices = @transform_5, window_bounds = array<i64: 16, 128>}]} {
    %c0_i32 = arith.constant 0 : i32
    %0 = arith.cmpi eq, %arg1, %c0_i32 : i32
    %1 = arith.extui %0 : i1 to i32
    %c0_i32_0 = arith.constant 0 : i32
    %2 = arith.cmpi ne, %1, %c0_i32_0 : i32
    scf.if %2 {
      %cst_16 = arith.constant 0.000000e+00 : f32
      %19 = vector.broadcast %cst_16 : f32 to vector<16x128xf32>
      %c0_17 = arith.constant 0 : index
      %c0_18 = arith.constant 0 : index
      %20 = vector.load %arg8[%c0_17, %c0_18] : memref<16x128xf32, #tpu.memory_space<vmem>>, vector<16x128xf32>
      tpu.vector_store %arg8[%c0_17, %c0_18], %19 {strides = array<i32>} : memref<16x128xf32, #tpu.memory_space<vmem>>, vector<16x128xf32>,
    } else {
    }
    %c0 = arith.constant 0 : index
    %c0_1 = arith.constant 0 : index
    %3 = vector.load %arg2[%c0, %c0_1] : memref<16x128xf32, #tpu.memory_space<vmem>>, vector<16x128xf32>
    %c0_2 = arith.constant 0 : index
    %c0_3 = arith.constant 0 : index
    %4 = vector.load %arg3[%c0_2, %c0_3] : memref<128x256xf32, #tpu.memory_space<vmem>>, vector<128x256xf32>
    %cst = arith.constant dense<0.000000e+00> : vector<16x256xf32>
    %5 = tpu.matmul %3, %4, %cst {dimension_numbers = #tpu.dot_dimension_numbers<[1], [0], [0], [1], [0, 0, 1, 1], [], []>} : vector<16x128xf32>, vector<128x256xf32>, vector<16x256xf32> -> vector<16x256xf32>
    %c0_4 = arith.constant 0 : index
    %c0_5 = arith.constant 0 : index
    %6 = vector.load %arg4[%c0_4, %c0_5] : memref<1x256xf32, #tpu.memory_space<vmem>>, vector<1x256xf32>
    %7 = vector.broadcast %6 : vector<1x256xf32> to vector<16x256xf32>
    %8 = arith.addf %5, %7 : vector<16x256xf32>
    %cst_6 = arith.constant 0.000000e+00 : f32
    %9 = vector.broadcast %cst_6 : f32 to vector<16x256xf32>
    %10 = arith.maximumf %8, %9 : vector<16x256xf32>
    %c0_7 = arith.constant 0 : index
    %c0_8 = arith.constant 0 : index
    %11 = vector.load %arg8[%c0_7, %c0_8] : memref<16x128xf32, #tpu.memory_space<vmem>>, vector<16x128xf32>
    %c0_9 = arith.constant 0 : index
    %c0_10 = arith.constant 0 : index
    %12 = vector.load %arg5[%c0_9, %c0_10] : memref<256x128xf32, #tpu.memory_space<vmem>>, vector<256x128xf32>
    %cst_11 = arith.constant dense<0.000000e+00> : vector<16x128xf32>
    %13 = tpu.matmul %10, %12, %cst_11 {dimension_numbers = #tpu.dot_dimension_numbers<[1], [0], [0], [1], [0, 0, 1, 1], [], []>} : vector<16x256xf32>, vector<256x128xf32>, vector<16x128xf32> -> vector<16x128xf32>
    %14 = arith.addf %11, %13 : vector<16x128xf32>
    %c0_12 = arith.constant 0 : index
    %c0_13 = arith.constant 0 : index
    %15 = vector.load %arg8[%c0_12, %c0_13] : memref<16x128xf32, #tpu.memory_space<vmem>>, vector<16x128xf32>
    tpu.vector_store %arg8[%c0_12, %c0_13], %14 {strides = array<i32>} : memref<16x128xf32, #tpu.memory_space<vmem>>, vector<16x128xf32>,
    %c0_i32_14 = arith.constant 0 : i32
    %16 = arith.cmpi eq, %arg1, %c0_i32_14 : i32
    %17 = arith.extui %16 : i1 to i32
    %c0_i32_15 = arith.constant 0 : i32
    %18 = arith.cmpi ne, %17, %c0_i32_15 : i32
    scf.if %18 {
      %c0_16 = arith.constant 0 : index
      %c0_17 = arith.constant 0 : index
      %19 = vector.load %arg8[%c0_16, %c0_17] : memref<16x128xf32, #tpu.memory_space<vmem>>, vector<16x128xf32>
      %c0_18 = arith.constant 0 : index
      %c0_19 = arith.constant 0 : index
      %20 = vector.load %arg6[%c0_18, %c0_19] : memref<1x128xf32, #tpu.memory_space<vmem>>, vector<1x128xf32>
      %21 = vector.broadcast %20 : vector<1x128xf32> to vector<16x128xf32>
      %22 = arith.addf %19, %21 : vector<16x128xf32>
      %23 = arith.addf %22, %3 : vector<16x128xf32>
      %c0_20 = arith.constant 0 : index
      %c0_21 = arith.constant 0 : index
      %24 = vector.load %arg7[%c0_20, %c0_21] : memref<16x128xf32, #tpu.memory_space<vmem>>, vector<16x128xf32>
      tpu.vector_store %arg7[%c0_20, %c0_21], %23 {strides = array<i32>} : memref<16x128xf32, #tpu.memory_space<vmem>>, vector<16x128xf32>,
    } else {
    }
    return
  }
  func.func @transform_0(%arg0: i32, %arg1: i32) -> (i32, i32) {
    %c0_i32 = arith.constant 0 : i32
    %c0_i32_0 = arith.constant 0 : i32
    return %arg0, %c0_i32 : i32, i32
  }
  func.func @transform_1(%arg0: i32, %arg1: i32) -> (i32, i32) {
    %c0_i32 = arith.constant 0 : i32
    %c0_i32_0 = arith.constant 0 : i32
    return %c0_i32, %arg1 : i32, i32
  }
  func.func @transform_2(%arg0: i32, %arg1: i32) -> (i32, i32) {
    %c0_i32 = arith.constant 0 : i32
    %c0_i32_0 = arith.constant 0 : i32
    return %c0_i32, %arg1 : i32, i32
  }
  func.func @transform_3(%arg0: i32, %arg1: i32) -> (i32, i32) {
    %c0_i32 = arith.constant 0 : i32
    %c0_i32_0 = arith.constant 0 : i32
    return %arg1, %c0_i32 : i32, i32
  }
  func.func @transform_4(%arg0: i32, %arg1: i32) -> (i32, i32) {
    %c0_i32 = arith.constant 0 : i32
    %c0_i32_0 = arith.constant 0 : i32
    %c0_i32_1 = arith.constant 0 : i32
    return %c0_i32, %c0_i32_0 : i32, i32
  }
  func.func @transform_5(%arg0: i32, %arg1: i32) -> (i32, i32) {
    %c0_i32 = arith.constant 0 : i32
    %c0_i32_0 = arith.constant 0 : i32
    return %arg0, %c0_i32 : i32, i32
  }
}

</mosaic_0001>

<bundles_post_ra>
// kernel: tpu_custom_call.1
= control target key start
LH: loop header
LB: loop body
LE: loop exit
PB: predicated region body
PF: predicated region fallthrough
CT: control target
= control target key end

     0   :  { %10 = vsyncpa [#allocation4], 0  ;;  %s546_s0 = inlined_call_operand.hbm [shape: f32[16,128], index: 0, kind: input, shape index: {}]   ;;  %s547_s1 = inlined_call_operand.hbm [shape: f32[128,256], index: 1, kind: input, shape index: {}]   ;;  %s548_s2 = inlined_call_operand.vmem [shape: f32[1,256], index: 2, kind: input, shape index: {}]   ;;  %s549_s3 = inlined_call_operand.hbm [shape: f32[256,128], index: 3, kind: input, shape index: {}]   ;;  %s550_s4 = inlined_call_operand.vmem [shape: f32[1,128], index: 4, kind: input, shape index: {}]   ;;  %s551_s5 = inlined_call_operand.hbm [shape: f32[16,128], index: 5, kind: output, shape index: {}]  }
   0x1   :  { %11 = vsyncpa [#allocation7], 0 }
   0x2   :  { %12 = vsyncpa [#allocation5], 0  ;;  %s478_s18 = smov [#allocation6]  }
   0x3   :  { %s30_s19 = sshll.u32 %s478_s18, 4  ;;  %s31_s19 = int_to_ptr.vmem [resolvable:$true] %s30_s19 }
   0x4   :  { %s400_s20 = scalar_lea.vmem %s31_s19, 4096  ;;  %p405_p1 = scmp.lt.s32.totalorder %s31_s19, %s31_s19 }
   0x5   :  { %p401_p0 = scmp.ne.s32.totalorder %s31_s19, %s400_s20  ;;  %p406_p2 = scmp.lt.s32.totalorder %s400_s20, %s400_s20 }
   0x7   :  { %p407_p3 = por %p406_p2, %p405_p1 }
   0x9   :  { %p408_p4 = pnand %p407_p3, %p401_p0 }
   0xb   :  { %411 = shalt.err (!%p408_p4)
}
   0xc   :  { %s479_s21 = smov 256   ;;  %s480_s22 = smov 16  }
   0xd   :  { %36 = dma.hbm_to_vmem [thread:$0]  %s547_s1, 4096, %s31_s19, [#allocation7], %s479_s21, %s479_s21, %s480_s22  }
   0xe   :  { %s481_s25 = smov [#allocation3]  }
   0xf   :  { %s18_s26 = sshll.u32 %s481_s25, 4  ;;  %s19_s26 = int_to_ptr.vmem [resolvable:$true] %s18_s26 }
  0x10   :  { %s420_s27 = scalar_lea.vmem %s19_s26, 256  ;;  %p425_p6 = scmp.lt.s32.totalorder %s19_s26, %s19_s26 }
  0x11   :  { %p421_p5 = scmp.ne.s32.totalorder %s19_s26, %s420_s27  ;;  %p426_p7 = scmp.lt.s32.totalorder %s420_s27, %s420_s27 }
  0x13   :  { %p427_p8 = por %p426_p7, %p425_p6 }
  0x15   :  { %p428_p9 = pnand %p427_p8, %p421_p5 }
  0x17   :  { %431 = shalt.err (!%p428_p9)
}
  0x18   :  { %s482_s28 = smov 128   ;;  %s483_s29 = smov 8  }
  0x19   :  { %24 = dma.hbm_to_vmem [thread:$0]  %s546_s0, 256, %s19_s26, [#allocation4], %s482_s28, %s482_s28, %s483_s29  }
  0x1a   :  { %s484_s1 = smov [#allocation8]  }
  0x1b   :  { %s44_s7 = sshll.u32 %s484_s1, 4  ;;  %s45_s7 = int_to_ptr.vmem [resolvable:$true] %s44_s7 }
  0x1c   :  { %s440_s8 = scalar_lea.vmem %s45_s7, 4096  ;;  %p445_p11 = scmp.lt.s32.totalorder %s45_s7, %s45_s7 }
  0x1d   :  { %p441_p10 = scmp.ne.s32.totalorder %s45_s7, %s440_s8  ;;  %p446_p12 = scmp.lt.s32.totalorder %s440_s8, %s440_s8 }
  0x1f   :  { %p447_p13 = por %p446_p12, %p445_p11 }
  0x21   :  { %p448_p0 = pnand %p447_p13, %p441_p10 }
  0x23   :  { %451 = shalt.err (!%p448_p0)
}
  0x24   :  { %50 = dma.hbm_to_vmem [thread:$0]  %s549_s3, 4096, %s45_s7, [#allocation7], %s482_s28, %s482_s28, %s483_s29  }
  0x25   :  { %472 = dma.done.wait [#allocation4], 256  }
  0x26   :  { %473 = vsyncadd [#allocation4], 4294967040 }
  0x27   :  { %474 = dma.done.wait [#allocation7], 8192  }
  0x28   :  { %475 = vsyncadd [#allocation7], 4294959104  ;;  %v485_v0 = vmov 0.0   ;;  %v101_v1 = vld [vmem:[#allocation6 + $0xf8] sm:$0xff]  ;;  %v100_v2 = vld [vmem:[#allocation6 + $0xf0] sm:$0xff]  ;;  %s486_s12 = smov [#allocation9]  }
  0x29   :  { %178 = vmatprep.mubr.f32.mxu0 %v485_v0  ;;  %v99_v3 = vld [vmem:[#allocation6 + $0xe8] sm:$0xff]  ;;  %114 = vmatprep.subr.mxu0 %v101_v1  ;;  %v98_v4 = vld [vmem:[#allocation6 + $0xe0] sm:$0xff]  ;;  %v97_v5 = vld [vmem:[#allocation6 + $0xd8] sm:$0xff]  ;;  %s331_s13 = sshll.u32 %s486_s12, 4  ;;  %s332_s13 = int_to_ptr.vmem [resolvable:$true] %s331_s13 }
  0x2a   :  { %115 = vmatpush1.msra.mxu0 %v100_v2  ;;  %v96_v6 = vld [vmem:[#allocation6 + $0xd0] sm:$0xff]  ;;  %v95_v7 = vld [vmem:[#allocation6 + $0xc8] sm:$0xff]  ;;  %v94_v8 = vld [vmem:[#allocation6 + $0xc0] sm:$0xff]  ;;  %s452_s14 = scalar_lea.vmem %s332_s13, 256  ;;  %p457_p2 = scmp.lt.s32.totalorder %s332_s13, %s332_s13 }
  0x2b   :  { %116 = vmatprep.subr.mxu0 %v99_v3  ;;  %v93_v9 = vld [vmem:[#allocation6 + $0xb8] sm:$0xff]  ;;  %v92_v10 = vld [vmem:[#allocation6 + $0xb0] sm:$0xff]  ;;  %v91_v11 = vld [vmem:[#allocation6 + $0xa8] sm:$0xff]  ;;  %p453_p1 = scmp.ne.s32.totalorder %s332_s13, %s452_s14  ;;  %p458_p3 = scmp.lt.s32.totalorder %s452_s14, %s452_s14 }
  0x2c   :  { %117 = vmatpush1.msra.mxu0 %v98_v4  ;;  %v90_v12 = vld [vmem:[#allocation6 + $0xa0] sm:$0xff]  ;;  %v89_v13 = vld [vmem:[#allocation6 + $0x98] sm:$0xff]  ;;  %v88_v14 = vld [vmem:[#allocation6 + $0x90] sm:$0xff] }
  0x2d   :  { %118 = vmatprep.subr.mxu0 %v97_v5  ;;  %v228_v15 = vld [vmem:[#allocation8 + $0xf8] sm:$0xff]  ;;  %v87_v17 = vld [vmem:[#allocation6 + $0x88] sm:$0xff]  ;;  %v227_v18 = vld [vmem:[#allocation8 + $0xf0] sm:$0xff]  ;;  %p459_p4 = por %p458_p3, %p457_p2 }
  0x2e   :  { %119 = vmatpush1.msra.mxu0 %v96_v6  ;;  %v212_v16 = vld [vmem:[#allocation8 + $0x78] sm:$0xff]  ;;  %345 = vmatprep.subr.mxu1 %v228_v15  ;;  %v211_v19 = vld [vmem:[#allocation8 + $0x70] sm:$0xff]  ;;  %v86_v20 = vld [vmem:[#allocation6 + $0x80] sm:$0xff] }
  0x2f   :  { %120 = vmatprep.subr.mxu0 %v95_v7  ;;  %346 = vmatpush3.msra.mxu1 %v212_v16  ;;  %v226_v21 = vld [vmem:[#allocation8 + $0xe8] sm:$0xff]  ;;  %v85_v22 = vld [vmem:[#allocation6 + $0x78] sm:$0xff]  ;;  %v84_v24 = vld [vmem:[#allocation6 + $0x70] sm:$0xff]  ;;  %p460_p5 = pnand %p459_p4, %p453_p1 }
  0x30   :  { %121 = vmatpush1.msra.mxu0 %v94_v8  ;;  %347 = vmatprep.subr.mxu1 %v227_v18  ;;  %v210_v23 = vld [vmem:[#allocation8 + $0x68] sm:$0xff]  ;;  %v225_v25 = vld [vmem:[#allocation8 + $0xe0] sm:$0xff]  ;;  %v224_v29 = vld [vmem:[#allocation8 + $0xd8] sm:$0xff] }
  0x31   :  { %122 = vmatprep.subr.mxu0 %v93_v9  ;;  %348 = vmatpush3.msra.mxu1 %v211_v19  ;;  %v83_v26 = vld [vmem:[#allocation6 + $0x68] sm:$0xff]  ;;  %v209_v27 = vld [vmem:[#allocation8 + $0x60] sm:$0xff]  ;;  %v81_v30 = vld [vmem:[#allocation6 + $0x58] sm:$0xff] }
  0x32   :  { %123 = vmatpush1.msra.mxu0 %v92_v10  ;;  %349 = vmatprep.subr.mxu1 %v226_v21  ;;  %v82_v28 = vld [vmem:[#allocation6 + $0x60] sm:$0xff]  ;;  %v208_v31 = vld [vmem:[#allocation8 + $0x58] sm:$0xff]  ;;  %v80_v32 = vld [vmem:[#allocation6 + $0x50] sm:$0xff] }
  0x33   :  { %124 = vmatprep.subr.mxu0 %v91_v11  ;;  %350 = vmatpush3.msra.mxu1 %v210_v23  ;;  %v223_v33 = vld [vmem:[#allocation8 + $0xd0] sm:$0xff]  ;;  %v79_v34 = vld [vmem:[#allocation6 + $0x48] sm:$0xff]  ;;  %v78_v36 = vld [vmem:[#allocation6 + $0x40] sm:$0xff] }
  0x34   :  { %125 = vmatpush1.msra.mxu0 %v90_v12  ;;  %351 = vmatprep.subr.mxu1 %v225_v25  ;;  %v207_v35 = vld [vmem:[#allocation8 + $0x50] sm:$0xff]  ;;  %v222_v37 = vld [vmem:[#allocation8 + $0xc8] sm:$0xff]  ;;  %v77_v38 = vld [vmem:[#allocation6 + $0x38] sm:$0xff] }
  0x35   :  { %126 = vmatprep.subr.mxu0 %v89_v13  ;;  %352 = vmatpush3.msra.mxu1 %v209_v27  ;;  %v206_v39 = vld [vmem:[#allocation8 + $0x48] sm:$0xff]  ;;  %v76_v40 = vld [vmem:[#allocation6 + $0x30] sm:$0xff]  ;;  %v221_v41 = vld [vmem:[#allocation8 + $0xc0] sm:$0xff] }
  0x36   :  { %127 = vmatpush1.msra.mxu0 %v88_v14  ;;  %353 = vmatprep.subr.mxu1 %v224_v29  ;;  %v75_v42 = vld [vmem:[#allocation6 + $0x28] sm:$0xff]  ;;  %v205_v43 = vld [vmem:[#allocation8 + $0x40] sm:$0xff]  ;;  %v220_v45 = vld [vmem:[#allocation8 + $0xb8] sm:$0xff] }
  0x37   :  { %128 = vmatprep.subr.mxu0 %v87_v17  ;;  %354 = vmatpush3.msra.mxu1 %v208_v31  ;;  %v74_v44 = vld [vmem:[#allocation6 + $0x20] sm:$0xff]  ;;  %v73_v46 = vld [vmem:[#allocation6 + $0x18] sm:$0xff]  ;;  %v72_v48 = vld [vmem:[#allocation6 + $0x10] sm:$0xff] }
  0x38   :  { %129 = vmatpush1.msra.mxu0 %v86_v20  ;;  %355 = vmatprep.subr.mxu1 %v223_v33  ;;  %v204_v47 = vld [vmem:[#allocation8 + $0x38] sm:$0xff]  ;;  %v219_v49 = vld [vmem:[#allocation8 + $0xb0] sm:$0xff]  ;;  %v71_v50 = vld [vmem:[#allocation6 + $0x8] sm:$0xff] }
  0x39   :  { %130 = vmatprep.subr.mxu0 %v85_v22  ;;  %356 = vmatpush3.msra.mxu1 %v207_v35  ;;  %v203_v51 = vld [vmem:[#allocation8 + $0x30] sm:$0xff]  ;;  %v70_v52 = vld [vmem:[#allocation6] sm:$0xff]  ;;  %v218_v53 = vld [vmem:[#allocation8 + $0xa8] sm:$0xff] }
  0x3a   :  { %131 = vmatpush1.msra.mxu0 %v84_v24  ;;  %357 = vmatprep.subr.mxu1 %v222_v37  ;;  %v68_v54 = vld [vmem:[#allocation3] sm:$0xff]  ;;  %v202_v55 = vld [vmem:[#allocation8 + $0x28] sm:$0xff]  ;;  %v217_v56 = vld [vmem:[#allocation8 + $0xa0] sm:$0xff] }
  0x3b   :  { %132 = vmatprep.subr.mxu0 %v83_v26  ;;  %358 = vmatpush3.msra.mxu1 %v206_v39  ;;  %v201_v57 = vld [vmem:[#allocation8 + $0x20] sm:$0xff]  ;;  %v69_v58 = vld [vmem:[#allocation3 + $0x8] sm:$0xff]  ;;  %v215_v61 = vld [vmem:[#allocation8 + $0x90] sm:$0xff] }
  0x3c   :  { %133 = vmatpush1.msra.mxu0 %v82_v28  ;;  %359 = vmatprep.subr.mxu1 %v221_v41  ;;  %v216_v59 = vld [vmem:[#allocation8 + $0x98] sm:$0xff]  ;;  %v199_v62 = vld [vmem:[#allocation8 + $0x10] sm:$0xff]  ;;  %v214_v63 = vld [vmem:[#allocation8 + $0x88] sm:$0xff] }
  0x3d   :  { %134 = vmatprep.subr.mxu0 %v81_v30  ;;  %360 = vmatpush3.msra.mxu1 %v205_v43  ;;  %v200_v60 = vld [vmem:[#allocation8 + $0x18] sm:$0xff]  ;;  %v198_v1 = vld [vmem:[#allocation8 + $0x8] sm:$0xff]  ;;  %v213_v2 = vld [vmem:[#allocation8 + $0x80] sm:$0xff] }
  0x3e   :  { %135 = vmatpush1.msra.mxu0 %v80_v32  ;;  %361 = vmatprep.subr.mxu1 %v220_v45  ;;  %v197_v3 = vld [vmem:[#allocation8] sm:$0xff]  ;;  %v102_v6 = vld [vmem:[%s548_s2] sm:$0x3] }
  0x3f   :  { %136 = vmatprep.subr.mxu0 %v79_v34  ;;  %362 = vmatpush3.msra.mxu1 %v204_v47  ;;  %v344_v24 = vld [vmem:[%s550_s4] ss:$0 sm:$0xff] }
  0x40   :  { %137 = vmatpush1.msra.mxu0 %v78_v36  ;;  %363 = vmatprep.subr.mxu1 %v219_v49 }
  0x41   :  { %138 = vmatprep.subr.mxu0 %v77_v38  ;;  %364 = vmatpush3.msra.mxu1 %v203_v51 }
  0x42   :  { %139 = vmatpush1.msra.mxu0 %v76_v40  ;;  %365 = vmatprep.subr.mxu1 %v218_v53 }
  0x43   :  { %140 = vmatprep.subr.mxu0 %v75_v42  ;;  %366 = vmatpush3.msra.mxu1 %v202_v55 }
  0x44   :  { %141 = vmatpush1.msra.mxu0 %v74_v44  ;;  %367 = vmatprep.subr.mxu1 %v217_v56 }
  0x45   :  { %142 = vmatprep.subr.mxu0 %v73_v46  ;;  %368 = vmatpush3.msra.mxu1 %v201_v57 }
  0x46   :  { %143 = vmatpush1.msra.mxu0 %v72_v48  ;;  %369 = vmatprep.subr.mxu1 %v216_v59 }
  0x47   :  { %144 = vmatprep.subr.mxu0 %v71_v50  ;;  %370 = vmatpush3.msra.mxu1 %v200_v60 }
  0x48   :  { %145 = vmatpush1.msra.mxu0 %v70_v52  ;;  %371 = vmatprep.subr.mxu1 %v215_v61 }
  0x49   :  { %179 = vmatmul.mubr.f32.vlgmr.msra.gmra.mxu0 %v68_v54  ;;  %372 = vmatpush3.msra.mxu1 %v199_v62 }
  0x4a   :  { %184 = vmatprep.mubr.f32.mxu0 %v485_v0  ;;  %373 = vmatprep.subr.mxu1 %v214_v63  ;;  %v104_v0 = vlaneseq }
  0x4b   :  { %374 = vmatpush3.msra.mxu1 %v198_v1 }
  0x4c   :  { %375 = vmatprep.subr.mxu1 %v213_v2  ;;  %v105_v4 = vshrl.u32 %v104_v0, 7 }
  0x4d   :  { %185 = vmatmul.mubr.f32.gmra.mxu0 %v69_v58  ;;  %376 = vmatpush3.msra.mxu1 %v197_v3 }
  0x4e   :  { %v106_v5 = vsub.s32 0, %v105_v4  ;;  %v110_v7 = vsub.s32 1, %v105_v4 }
  0x50   :  { %v107_v8 = vrot.slane %v102_v6, %v106_v5  ;;  %v111_v9 = vrot.slane %v102_v6, %v110_v7 }
 0x109   :  { %v180_v10 = vpop.f32.mrf.mxu0 }
 0x10a   :  { %v181_v11 = vadd.f32 %v180_v10, %v107_v8 }
 0x10b   :  { %v182_v12 = vpop.f32.mrf.mxu0 }
 0x10c   :  { %v183_v13 = vadd.f32 %v182_v12, %v111_v9  ;;  %v191_v16 = vmax.f32 %v181_v11, 0.0 }
 0x10d   :  { %v186_v14 = vpop.f32.mrf.mxu0 }
 0x10e   :  { %v192_v15 = vmax.f32 %v183_v13, 0.0  ;;  %v187_v17 = vadd.f32 %v186_v14, %v107_v8 }
 0x10f   :  { %v188_v18 = vpop.f32.mrf.mxu0 }
 0x110   :  { %v189_v19 = vadd.f32 %v188_v18, %v111_v9  ;;  %293 = vmatprep.mubr.f32.mxu1 %v192_v15  ;;  %v193_v21 = vmax.f32 %v187_v17, 0.0 }
 0x111   :  { %294 = vmatmul.mubr.f32.vlgmr.msra.gmra.mxu1 %v191_v16 }
 0x112   :  { %v194_v20 = vmax.f32 %v189_v19, 0.0 }
 0x114   :  { %298 = vmatprep.mubr.f32.mxu1 %v194_v20 }
 0x115   :  { %299 = vmatmul.mubr.f32.gmra.mxu1 %v193_v21 }
 0x1d1   :  { %v377_v22 = vpop.f32.mrf.mxu1 }
 0x1d3   :  { %v378_v23 = vpop.f32.mrf.mxu1 }
 0x1d4   :  { %v379_v25 = vadd.f32 %v378_v23, %v377_v22 }
 0x1d5   :  { %v380_v26 = vpop.f32.mrf.mxu1 }
 0x1d6   :  { %v320_v27 = vadd.f32 %v379_v25, %v344_v24 }
 0x1d7   :  { %v381_v28 = vpop.f32.mrf.mxu1 }
 0x1d8   :  { %v322_v29 = vadd.f32 %v320_v27, %v68_v54  ;;  %v382_v30 = vadd.f32 %v381_v28, %v380_v26 }
 0x1da   :  { %324 = vst [vmem:[#allocation9] sm:$0xff] %v322_v29  ;;  %v321_v31 = vadd.f32 %v382_v30, %v344_v24 }
 0x1dc   :  { %v323_v32 = vadd.f32 %v321_v31, %v69_v58 }
 0x1de   :  { %325 = vst [vmem:[#allocation9 + $0x8] sm:$0xff] %v323_v32 }
 0x1df   :  { %463 = shalt.err (!%p460_p5)
}
 0x1e0   :  { %337 = dma.vmem_to_hbm [thread:$0]  %s332_s13, 256, %s551_s5, [#allocation5], %s482_s28, %s482_s28, %s483_s29  }
 0x1e1   :  { %476 = dma.done.wait [#allocation5], 256  }
 0x1e2   :  { %477 = vsyncadd [#allocation5], 4294967040 }
 0x1e3   :  { %341 = vsyncpa [#allocation4], 1 }
 0x1e4   :  { %342 = vsyncpa [#allocation7], 1 }
 0x1e5   :  { %343 = vsyncpa [#allocation5], 1 }

// kernel: tpu_custom_call.1
= control target key start
LH: loop header
LB: loop body
LE: loop exit
PB: predicated region body
PF: predicated region fallthrough
CT: control target
= control target key end

     0   :  { %10 = vsyncpa [#allocation4], 0  ;;  %s546_s0 = inlined_call_operand.hbm [shape: f32[16,128], index: 0, kind: input, shape index: {}]   ;;  %s547_s1 = inlined_call_operand.hbm [shape: f32[128,256], index: 1, kind: input, shape index: {}]   ;;  %s548_s2 = inlined_call_operand.vmem [shape: f32[1,256], index: 2, kind: input, shape index: {}]   ;;  %s549_s3 = inlined_call_operand.hbm [shape: f32[256,128], index: 3, kind: input, shape index: {}]   ;;  %s550_s4 = inlined_call_operand.vmem [shape: f32[1,128], index: 4, kind: input, shape index: {}]   ;;  %s551_s5 = inlined_call_operand.hbm [shape: f32[16,128], index: 5, kind: output, shape index: {}]  }
   0x1   :  { %11 = vsyncpa [#allocation7], 0 }
   0x2   :  { %12 = vsyncpa [#allocation5], 0  ;;  %s478_s18 = smov [#allocation6]  }
   0x3   :  { %s30_s19 = sshll.u32 %s478_s18, 4  ;;  %s31_s19 = int_to_ptr.vmem [resolvable:$true] %s30_s19 }
   0x4   :  { %s400_s20 = scalar_lea.vmem %s31_s19, 4096  ;;  %p405_p1 = scmp.lt.s32.totalorder %s31_s19, %s31_s19 }
   0x5   :  { %p401_p0 = scmp.ne.s32.totalorder %s31_s19, %s400_s20  ;;  %p406_p2 = scmp.lt.s32.totalorder %s400_s20, %s400_s20 }
   0x7   :  { %p407_p3 = por %p406_p2, %p405_p1 }
   0x9   :  { %p408_p4 = pnand %p407_p3, %p401_p0 }
   0xb   :  { %411 = shalt.err (!%p408_p4)
}
   0xc   :  { %s479_s21 = smov 256   ;;  %s480_s22 = smov 16  }
   0xd   :  { %36 = dma.hbm_to_vmem [thread:$0]  %s547_s1, 4096, %s31_s19, [#allocation7], %s479_s21, %s479_s21, %s480_s22  }
   0xe   :  { %s481_s25 = smov [#allocation3]  }
   0xf   :  { %s18_s26 = sshll.u32 %s481_s25, 4  ;;  %s19_s26 = int_to_ptr.vmem [resolvable:$true] %s18_s26 }
  0x10   :  { %s420_s27 = scalar_lea.vmem %s19_s26, 256  ;;  %p425_p6 = scmp.lt.s32.totalorder %s19_s26, %s19_s26 }
  0x11   :  { %p421_p5 = scmp.ne.s32.totalorder %s19_s26, %s420_s27  ;;  %p426_p7 = scmp.lt.s32.totalorder %s420_s27, %s420_s27 }
  0x13   :  { %p427_p8 = por %p426_p7, %p425_p6 }
  0x15   :  { %p428_p9 = pnand %p427_p8, %p421_p5 }
  0x17   :  { %431 = shalt.err (!%p428_p9)
}
  0x18   :  { %s482_s28 = smov 128   ;;  %s483_s29 = smov 8  }
  0x19   :  { %24 = dma.hbm_to_vmem [thread:$0]  %s546_s0, 256, %s19_s26, [#allocation4], %s482_s28, %s482_s28, %s483_s29  }
  0x1a   :  { %s484_s1 = smov [#allocation8]  }
  0x1b   :  { %s44_s7 = sshll.u32 %s484_s1, 4  ;;  %s45_s7 = int_to_ptr.vmem [resolvable:$true] %s44_s7 }
  0x1c   :  { %s440_s8 = scalar_lea.vmem %s45_s7, 4096  ;;  %p445_p11 = scmp.lt.s32.totalorder %s45_s7, %s45_s7 }
  0x1d   :  { %p441_p10 = scmp.ne.s32.totalorder %s45_s7, %s440_s8  ;;  %p446_p12 = scmp.lt.s32.totalorder %s440_s8, %s440_s8 }
  0x1f   :  { %p447_p13 = por %p446_p12, %p445_p11 }
  0x21   :  { %p448_p0 = pnand %p447_p13, %p441_p10 }
  0x23   :  { %451 = shalt.err (!%p448_p0)
}
  0x24   :  { %50 = dma.hbm_to_vmem [thread:$0]  %s549_s3, 4096, %s45_s7, [#allocation7], %s482_s28, %s482_s28, %s483_s29  }
  0x25   :  { %472 = dma.done.wait [#allocation4], 256  }
  0x26   :  { %473 = vsyncadd [#allocation4], 4294967040 }
  0x27   :  { %474 = dma.done.wait [#allocation7], 8192  }
  0x28   :  { %475 = vsyncadd [#allocation7], 4294959104  ;;  %v485_v0 = vmov 0.0   ;;  %v101_v1 = vld [vmem:[#allocation6 + $0xf8] sm:$0xff]  ;;  %v100_v2 = vld [vmem:[#allocation6 + $0xf0] sm:$0xff]  ;;  %s486_s12 = smov [#allocation9]  }
  0x29   :  { %178 = vmatprep.mubr.f32.mxu0 %v485_v0  ;;  %v99_v3 = vld [vmem:[#allocation6 + $0xe8] sm:$0xff]  ;;  %114 = vmatprep.subr.mxu0 %v101_v1  ;;  %v98_v4 = vld [vmem:[#allocation6 + $0xe0] sm:$0xff]  ;;  %v97_v5 = vld [vmem:[#allocation6 + $0xd8] sm:$0xff]  ;;  %s331_s13 = sshll.u32 %s486_s12, 4  ;;  %s332_s13 = int_to_ptr.vmem [resolvable:$true] %s331_s13 }
  0x2a   :  { %115 = vmatpush1.msra.mxu0 %v100_v2  ;;  %v96_v6 = vld [vmem:[#allocation6 + $0xd0] sm:$0xff]  ;;  %v95_v7 = vld [vmem:[#allocation6 + $0xc8] sm:$0xff]  ;;  %v94_v8 = vld [vmem:[#allocation6 + $0xc0] sm:$0xff]  ;;  %s452_s14 = scalar_lea.vmem %s332_s13, 256  ;;  %p457_p2 = scmp.lt.s32.totalorder %s332_s13, %s332_s13 }
  0x2b   :  { %116 = vmatprep.subr.mxu0 %v99_v3  ;;  %v93_v9 = vld [vmem:[#allocation6 + $0xb8] sm:$0xff]  ;;  %v92_v10 = vld [vmem:[#allocation6 + $0xb0] sm:$0xff]  ;;  %v91_v11 = vld [vmem:[#allocation6 + $0xa8] sm:$0xff]  ;;  %p453_p1 = scmp.ne.s32.totalorder %s332_s13, %s452_s14  ;;  %p458_p3 = scmp.lt.s32.totalorder %s452_s14, %s452_s14 }
  0x2c   :  { %117 = vmatpush1.msra.mxu0 %v98_v4  ;;  %v90_v12 = vld [vmem:[#allocation6 + $0xa0] sm:$0xff]  ;;  %v89_v13 = vld [vmem:[#allocation6 + $0x98] sm:$0xff]  ;;  %v88_v14 = vld [vmem:[#allocation6 + $0x90] sm:$0xff] }
  0x2d   :  { %118 = vmatprep.subr.mxu0 %v97_v5  ;;  %v228_v15 = vld [vmem:[#allocation8 + $0xf8] sm:$0xff]  ;;  %v87_v17 = vld [vmem:[#allocation6 + $0x88] sm:$0xff]  ;;  %v227_v18 = vld [vmem:[#allocation8 + $0xf0] sm:$0xff]  ;;  %p459_p4 = por %p458_p3, %p457_p2 }
  0x2e   :  { %119 = vmatpush1.msra.mxu0 %v96_v6  ;;  %v212_v16 = vld [vmem:[#allocation8 + $0x78] sm:$0xff]  ;;  %345 = vmatprep.subr.mxu1 %v228_v15  ;;  %v211_v19 = vld [vmem:[#allocation8 + $0x70] sm:$0xff]  ;;  %v86_v20 = vld [vmem:[#allocation6 + $0x80] sm:$0xff] }
  0x2f   :  { %120 = vmatprep.subr.mxu0 %v95_v7  ;;  %346 = vmatpush3.msra.mxu1 %v212_v16  ;;  %v226_v21 = vld [vmem:[#allocation8 + $0xe8] sm:$0xff]  ;;  %v85_v22 = vld [vmem:[#allocation6 + $0x78] sm:$0xff]  ;;  %v84_v24 = vld [vmem:[#allocation6 + $0x70] sm:$0xff]  ;;  %p460_p5 = pnand %p459_p4, %p453_p1 }
  0x30   :  { %121 = vmatpush1.msra.mxu0 %v94_v8  ;;  %347 = vmatprep.subr.mxu1 %v227_v18  ;;  %v210_v23 = vld [vmem:[#allocation8 + $0x68] sm:$0xff]  ;;  %v225_v25 = vld [vmem:[#allocation8 + $0xe0] sm:$0xff]  ;;  %v224_v29 = vld [vmem:[#allocation8 + $0xd8] sm:$0xff] }
  0x31   :  { %122 = vmatprep.subr.mxu0 %v93_v9  ;;  %348 = vmatpush3.msra.mxu1 %v211_v19  ;;  %v83_v26 = vld [vmem:[#allocation6 + $0x68] sm:$0xff]  ;;  %v209_v27 = vld [vmem:[#allocation8 + $0x60] sm:$0xff]  ;;  %v81_v30 = vld [vmem:[#allocation6 + $0x58] sm:$0xff] }
  0x32   :  { %123 = vmatpush1.msra.mxu0 %v92_v10  ;;  %349 = vmatprep.subr.mxu1 %v226_v21  ;;  %v82_v28 = vld [vmem:[#allocation6 + $0x60] sm:$0xff]  ;;  %v208_v31 = vld [vmem:[#allocation8 + $0x58] sm:$0xff]  ;;  %v80_v32 = vld [vmem:[#allocation6 + $0x50] sm:$0xff] }
  0x33   :  { %124 = vmatprep.subr.mxu0 %v91_v11  ;;  %350 = vmatpush3.msra.mxu1 %v210_v23  ;;  %v223_v33 = vld [vmem:[#allocation8 + $0xd0] sm:$0xff]  ;;  %v79_v34 = vld [vmem:[#allocation6 + $0x48] sm:$0xff]  ;;  %v78_v36 = vld [vmem:[#allocation6 + $0x40] sm:$0xff] }
  0x34   :  { %125 = vmatpush1.msra.mxu0 %v90_v12  ;;  %351 = vmatprep.subr.mxu1 %v225_v25  ;;  %v207_v35 = vld [vmem:[#allocation8 + $0x50] sm:$0xff]  ;;  %v222_v37 = vld [vmem:[#allocation8 + $0xc8] sm:$0xff]  ;;  %v77_v38 = vld [vmem:[#allocation6 + $0x38] sm:$0xff] }
  0x35   :  { %126 = vmatprep.subr.mxu0 %v89_v13  ;;  %352 = vmatpush3.msra.mxu1 %v209_v27  ;;  %v206_v39 = vld [vmem:[#allocation8 + $0x48] sm:$0xff]  ;;  %v76_v40 = vld [vmem:[#allocation6 + $0x30] sm:$0xff]  ;;  %v221_v41 = vld [vmem:[#allocation8 + $0xc0] sm:$0xff] }
  0x36   :  { %127 = vmatpush1.msra.mxu0 %v88_v14  ;;  %353 = vmatprep.subr.mxu1 %v224_v29  ;;  %v75_v42 = vld [vmem:[#allocation6 + $0x28] sm:$0xff]  ;;  %v205_v43 = vld [vmem:[#allocation8 + $0x40] sm:$0xff]  ;;  %v220_v45 = vld [vmem:[#allocation8 + $0xb8] sm:$0xff] }
  0x37   :  { %128 = vmatprep.subr.mxu0 %v87_v17  ;;  %354 = vmatpush3.msra.mxu1 %v208_v31  ;;  %v74_v44 = vld [vmem:[#allocation6 + $0x20] sm:$0xff]  ;;  %v73_v46 = vld [vmem:[#allocation6 + $0x18] sm:$0xff]  ;;  %v72_v48 = vld [vmem:[#allocation6 + $0x10] sm:$0xff] }
  0x38   :  { %129 = vmatpush1.msra.mxu0 %v86_v20  ;;  %355 = vmatprep.subr.mxu1 %v223_v33  ;;  %v204_v47 = vld [vmem:[#allocation8 + $0x38] sm:$0xff]  ;;  %v219_v49 = vld [vmem:[#allocation8 + $0xb0] sm:$0xff]  ;;  %v71_v50 = vld [vmem:[#allocation6 + $0x8] sm:$0xff] }
  0x39   :  { %130 = vmatprep.subr.mxu0 %v85_v22  ;;  %356 = vmatpush3.msra.mxu1 %v207_v35  ;;  %v203_v51 = vld [vmem:[#allocation8 + $0x30] sm:$0xff]  ;;  %v70_v52 = vld [vmem:[#allocation6] sm:$0xff]  ;;  %v218_v53 = vld [vmem:[#allocation8 + $0xa8] sm:$0xff] }
  0x3a   :  { %131 = vmatpush1.msra.mxu0 %v84_v24  ;;  %357 = vmatprep.subr.mxu1 %v222_v37  ;;  %v68_v54 = vld [vmem:[#allocation3] sm:$0xff]  ;;  %v202_v55 = vld [vmem:[#allocation8 + $0x28] sm:$0xff]  ;;  %v217_v56 = vld [vmem:[#allocation8 + $0xa0] sm:$0xff] }
  0x3b   :  { %132 = vmatprep.subr.mxu0 %v83_v26  ;;  %358 = vmatpush3.msra.mxu1 %v206_v39  ;;  %v201_v57 = vld [vmem:[#allocation8 + $0x20] sm:$0xff]  ;;  %v69_v58 = vld [vmem:[#allocation3 + $0x8] sm:$0xff]  ;;  %v215_v61 = vld [vmem:[#allocation8 + $0x90] sm:$0xff] }
  0x3c   :  { %133 = vmatpush1.msra.mxu0 %v82_v28  ;;  %359 = vmatprep.subr.mxu1 %v221_v41  ;;  %v216_v59 = vld [vmem:[#allocation8 + $0x98] sm:$0xff]  ;;  %v199_v62 = vld [vmem:[#allocation8 + $0x10] sm:$0xff]  ;;  %v214_v63 = vld [vmem:[#allocation8 + $0x88] sm:$0xff] }
  0x3d   :  { %134 = vmatprep.subr.mxu0 %v81_v30  ;;  %360 = vmatpush3.msra.mxu1 %v205_v43  ;;  %v200_v60 = vld [vmem:[#allocation8 + $0x18] sm:$0xff]  ;;  %v198_v1 = vld [vmem:[#allocation8 + $0x8] sm:$0xff]  ;;  %v213_v2 = vld [vmem:[#allocation8 + $0x80] sm:$0xff] }
  0x3e   :  { %135 = vmatpush1.msra.mxu0 %v80_v32  ;;  %361 = vmatprep.subr.mxu1 %v220_v45  ;;  %v197_v3 = vld [vmem:[#allocation8] sm:$0xff]  ;;  %v102_v6 = vld [vmem:[%s548_s2] sm:$0x3] }
  0x3f   :  { %136 = vmatprep.subr.mxu0 %v79_v34  ;;  %362 = vmatpush3.msra.mxu1 %v204_v47  ;;  %v344_v24 = vld [vmem:[%s550_s4] ss:$0 sm:$0xff] }
  0x40   :  { %137 = vmatpush1.msra.mxu0 %v78_v36  ;;  %363 = vmatprep.subr.mxu1 %v219_v49 }
  0x41   :  { %138 = vmatprep.subr.mxu0 %v77_v38  ;;  %364 = vmatpush3.msra.mxu1 %v203_v51 }
  0x42   :  { %139 = vmatpush1.msra.mxu0 %v76_v40  ;;  %365 = vmatprep.subr.mxu1 %v218_v53 }
  0x43   :  { %140 = vmatprep.subr.mxu0 %v75_v42  ;;  %366 = vmatpush3.msra.mxu1 %v202_v55 }
  0x44   :  { %141 = vmatpush1.msra.mxu0 %v74_v44  ;;  %367 = vmatprep.subr.mxu1 %v217_v56 }
  0x45   :  { %142 = vmatprep.subr.mxu0 %v73_v46  ;;  %368 = vmatpush3.msra.mxu1 %v201_v57 }
  0x46   :  { %143 = vmatpush1.msra.mxu0 %v72_v48  ;;  %369 = vmatprep.subr.mxu1 %v216_v59 }
  0x47   :  { %144 = vmatprep.subr.mxu0 %v71_v50  ;;  %370 = vmatpush3.msra.mxu1 %v200_v60 }
  0x48   :  { %145 = vmatpush1.msra.mxu0 %v70_v52  ;;  %371 = vmatprep.subr.mxu1 %v215_v61 }
  0x49   :  { %179 = vmatmul.mubr.f32.vlgmr.msra.gmra.mxu0 %v68_v54  ;;  %372 = vmatpush3.msra.mxu1 %v199_v62 }
  0x4a   :  { %184 = vmatprep.mubr.f32.mxu0 %v485_v0  ;;  %373 = vmatprep.subr.mxu1 %v214_v63  ;;  %v104_v0 = vlaneseq }
  0x4b   :  { %374 = vmatpush3.msra.mxu1 %v198_v1 }
  0x4c   :  { %375 = vmatprep.subr.mxu1 %v213_v2  ;;  %v105_v4 = vshrl.u32 %v104_v0, 7 }
  0x4d   :  { %185 = vmatmul.mubr.f32.gmra.mxu0 %v69_v58  ;;  %376 = vmatpush3.msra.mxu1 %v197_v3 }
  0x4e   :  { %v106_v5 = vsub.s32 0, %v105_v4  ;;  %v110_v7 = vsub.s32 1, %v105_v4 }
  0x50   :  { %v107_v8 = vrot.slane %v102_v6, %v106_v5  ;;  %v111_v9 = vrot.slane %v102_v6, %v110_v7 }
 0x109   :  { %v180_v10 = vpop.f32.mrf.mxu0 }
 0x10a   :  { %v181_v11 = vadd.f32 %v180_v10, %v107_v8 }
 0x10b   :  { %v182_v12 = vpop.f32.mrf.mxu0 }
 0x10c   :  { %v183_v13 = vadd.f32 %v182_v12, %v111_v9  ;;  %v191_v16 = vmax.f32 %v181_v11, 0.0 }
 0x10d   :  { %v186_v14 = vpop.f32.mrf.mxu0 }
 0x10e   :  { %v192_v15 = vmax.f32 %v183_v13, 0.0  ;;  %v187_v17 = vadd.f32 %v186_v14, %v107_v8 }
 0x10f   :  { %v188_v18 = vpop.f32.mrf.mxu0 }
 0x110   :  { %v189_v19 = vadd.f32 %v188_v18, %v111_v9  ;;  %293 = vmatprep.mubr.f32.mxu1 %v192_v15  ;;  %v193_v21 = vmax.f32 %v187_v17, 0.0 }
 0x111   :  { %294 = vmatmul.mubr.f32.vlgmr.msra.gmra.mxu1 %v191_v16 }
 0x112   :  { %v194_v20 = vmax.f32 %v189_v19, 0.0 }
 0x114   :  { %298 = vmatprep.mubr.f32.mxu1 %v194_v20 }
 0x115   :  { %299 = vmatmul.mubr.f32.gmra.mxu1 %v193_v21 }
 0x1d1   :  { %v377_v22 = vpop.f32.mrf.mxu1 }
 0x1d3   :  { %v378_v23 = vpop.f32.mrf.mxu1 }
 0x1d4   :  { %v379_v25 = vadd.f32 %v378_v23, %v377_v22 }
 0x1d5   :  { %v380_v26 = vpop.f32.mrf.mxu1 }
 0x1d6   :  { %v320_v27 = vadd.f32 %v379_v25, %v344_v24 }
 0x1d7   :  { %v381_v28 = vpop.f32.mrf.mxu1 }
 0x1d8   :  { %v322_v29 = vadd.f32 %v320_v27, %v68_v54  ;;  %v382_v30 = vadd.f32 %v381_v28, %v380_v26 }
 0x1da   :  { %324 = vst [vmem:[#allocation9] sm:$0xff] %v322_v29  ;;  %v321_v31 = vadd.f32 %v382_v30, %v344_v24 }
 0x1dc   :  { %v323_v32 = vadd.f32 %v321_v31, %v69_v58 }
 0x1de   :  { %325 = vst [vmem:[#allocation9 + $0x8] sm:$0xff] %v323_v32 }
 0x1df   :  { %463 = shalt.err (!%p460_p5)
}
 0x1e0   :  { %337 = dma.vmem_to_hbm [thread:$0]  %s332_s13, 256, %s551_s5, [#allocation5], %s482_s28, %s482_s28, %s483_s29  }
 0x1e1   :  { %476 = dma.done.wait [#allocation5], 256  }
 0x1e2   :  { %477 = vsyncadd [#allocation5], 4294967040 }
 0x1e3   :  { %341 = vsyncpa [#allocation4], 1 }
 0x1e4   :  { %342 = vsyncpa [#allocation7], 1 }
 0x1e5   :  { %343 = vsyncpa [#allocation5], 1 }

</bundles_post_ra>
